<compile_context>
chip_gen: v5e
topology: v5e:2x2
jax: 0.10.0
libtpu: 0.0.40
codegen_flags: <defaults>
</compile_context>

<pallas_src>
import functools

import jax
import jax.numpy as jnp
from jax.experimental import pallas as pl
from jax.experimental.pallas import tpu as pltpu

_LANES = 128
_TARGET_BLOCK_BYTES = 2 * 1024 * 1024   # ~2 MiB per block -> ~85% of HBM roofline
_MIN_PALLAS_ELEMS = 1 << 16             # below this, fused jnp.exp beats a kernel launch


def _round_up(x: int, m: int) -> int:
    return -(-x // m) * m


def _round_down(x: int, m: int) -> int:
    return (x // m) * m


# --------------------------------------------------------------------------- #
# Pallas kernel: positive-constraint transform only (scale = exp(log_scale)).
# --------------------------------------------------------------------------- #
def _exp_kernel(x_ref, o_ref, *, compute_dtype):
    o_ref[...] = jnp.exp(x_ref[...].astype(compute_dtype)).astype(o_ref.dtype)


def _compute_dtype(dtype):
    """Pick the exp compute dtype: native for >=32-bit, f32 on v5-class for sub-32-bit."""
    dtype = jnp.dtype(dtype)
    if dtype.itemsize >= 4:
        return dtype  # f32 params: astype is a trace-time no-op
    try:
        kind = jax.devices()[0].device_kind.lower()
        needs_f32 = any(g in kind for g in ("v2", "v3", "v4", "v5"))
    except Exception:  # pragma: no cover - conservative fallback
        needs_f32 = True
    return jnp.float32 if needs_f32 else dtype


def _pick_block_rows(rows: int, row_bytes: int) -> int:
    """Rows per block: ~2 MiB of data, multiple of 8, and >=2 grid steps when possible."""
    target = max(8, _round_down(_TARGET_BLOCK_BYTES // max(row_bytes, 1), 8))
    # Cap at ~half the rows so the grid has at least 2 "parallel" steps
    # (lets v7x's two TensorCores split the stream; free on v5e/v6e).
    half = max(8, _round_up(-(-rows // 2), 8))
    target = min(target, half)
    if target >= rows:
        return rows  # single full-extent block (exempt from the 8-divisibility rule)
    return target


def _exp_2d(x2d: jax.Array) -> jax.Array:
    """exp over a lane-dense 2D slab; Pallas handles any ragged final row-block."""
    R, C = x2d.shape
    block_rows = _pick_block_rows(R, C * jnp.dtype(x2d.dtype).itemsize)
    kernel = functools.partial(_exp_kernel, compute_dtype=_compute_dtype(x2d.dtype))
    spec = pl.BlockSpec((block_rows, C), lambda i: (i, 0))
    return pl.pallas_call(
        kernel,
        out_shape=jax.ShapeDtypeStruct((R, C), x2d.dtype),
        grid=(pl.cdiv(R, block_rows),),
        in_specs=[spec],
        out_specs=spec,
        compiler_params=pltpu.CompilerParams(dimension_semantics=("parallel",)),
    )(x2d)


def pallas_exp(x: jax.Array, *, min_pallas_elems: int = _MIN_PALLAS_ELEMS) -> jax.Array:
    """Elementwise exp, routed through the Pallas kernel when it pays off."""
    n = x.size
    if n == 0:
        return x
    if n < min_pallas_elems:
        # Tiny parameter tensors: kernel launch + DMA setup dwarf the work.
        return jnp.exp(x)

    shape = x.shape
    itemsize = jnp.dtype(x.dtype).itemsize
    last = shape[-1] if x.ndim >= 1 else 1

    if n % _LANES == 0:
        # Lane-aligned element count: contiguous reshape only, zero padding.
        if x.ndim >= 2 and last % _LANES == 0 and 8 * last * itemsize <= _TARGET_BLOCK_BYTES:
            cols = last          # keep the natural wide, lane-dense trailing dim
        else:
            cols = _LANES        # fall back to a (rows, 128) slab
        return _exp_2d(x.reshape(-1, cols)).reshape(shape)

    # Unaligned: pad the flat tail by at most 127 elements to a full 128-lane row.
    flat = x.reshape(-1)
    pad = _round_up(n, _LANES) - n
    flat = jnp.pad(flat, (0, pad))
    out = _exp_2d(flat.reshape(-1, _LANES))
    return out.reshape(-1)[:n].reshape(shape)


# --------------------------------------------------------------------------- #
# JAX "module": mirrors ParameterizedDistribution(Normal, loc=..., scale=...)
# --------------------------------------------------------------------------- #
class ParameterizedNormal:
    """JAX/Pallas port of ParameterizedDistribution for cls=Normal."""

    def __init__(self, loc: jax.Array, scale: jax.Array, *,
                 min_pallas_elems: int = _MIN_PALLAS_ELEMS):
        # loc:   identity transform + _clone=True  ->  stored as `1 * loc`
        # scale: transform_to(positive).inv        ->  stored as log(scale)
        self.loc_unconstrained = 1.0 * loc
        self.log_scale_unconstrained = jnp.log(scale)
        self._min_pallas_elems = min_pallas_elems

    def forward(self):
        # Identity-transform branch of forward(): `1 * value`. JAX arrays are
        # immutable, so returning the stored parameter preserves the torch
        # clone semantics with zero HBM traffic.
        loc = self.loc_unconstrained

        # Positive-constraint branch: scale = exp(log_scale) via the Pallas kernel.
        scale = pallas_exp(self.log_scale_unconstrained,
                           min_pallas_elems=self._min_pallas_elems)

        # TODO(synk): constructing a torch.distributions.Normal object has no
        # Pallas/JAX-array equivalent; return the constrained parameter dict.
        return {"loc": loc, "scale": scale}

    __call__ = forward


if __name__ == "__main__":
    key = jax.random.PRNGKey(0)
    k_loc, k_scale = jax.random.split(key)

    # Small parameter tensors consistent with the module: (2, 4, 16, 16).
    shape = (2, 4, 16, 16)
    loc_init = jax.random.normal(k_loc, shape, dtype=jnp.float32)
    scale_init = jax.random.uniform(
        k_scale, shape, dtype=jnp.float32, minval=0.5, maxval=2.0
    )

    # min_pallas_elems=0 forces the Pallas path even at this small demo size
    # (the default threshold would route such tiny tensors to fused jnp.exp).
    module = ParameterizedNormal(loc_init, scale_init, min_pallas_elems=0)
    out = jax.block_until_ready(module())

    # Reference check against the plain-JAX forward semantics.
    ref_loc = 1.0 * module.loc_unconstrained
    ref_scale = jnp.exp(module.log_scale_unconstrained)
    assert out["loc"].shape == shape and out["scale"].shape == shape
    assert jnp.allclose(out["loc"], ref_loc, atol=1e-6, rtol=1e-6)
    assert jnp.allclose(out["scale"], ref_scale, atol=1e-6, rtol=1e-6)
    # Round-trip: constrained scale should match the original init (log/exp is lossy).
    assert jnp.allclose(out["scale"], scale_init, atol=1e-5, rtol=1e-5)

    # Also exercise the wide, zero-pad path with a ragged final row-block.
    x_aligned = jax.random.normal(jax.random.PRNGKey(1), (24, 256), dtype=jnp.float32)
    y_aligned = jax.block_until_ready(pallas_exp(x_aligned, min_pallas_elems=0))
    assert jnp.allclose(y_aligned, jnp.exp(x_aligned), atol=1e-6, rtol=1e-6)

    print("KERNEL_OK")
</pallas_src>

<mosaic_0001>
module attributes {stable_mosaic.version = 11 : i64} {
  func.func @_exp_kernel(%arg0: i32, %arg1: memref<8x128xf32, #tpu.memory_space<vmem>>, %arg2: memref<8x128xf32, #tpu.memory_space<vmem>>) attributes {dimension_semantics = [#tpu.dimension_semantics<parallel>], iteration_bounds = array<i64: 2>, scalar_prefetch = 0 : i64, scratch_operands = 0 : i64, tpu.core_type = #tpu.core_type<tc>, window_params = [{transform_indices = @transform_0, window_bounds = array<i64: 8, 128>}, {transform_indices = @transform_1, window_bounds = array<i64: 8, 128>}]} {
    %c0 = arith.constant 0 : index
    %c0_0 = arith.constant 0 : index
    %0 = vector.load %arg1[%c0, %c0_0] : memref<8x128xf32, #tpu.memory_space<vmem>>, vector<8x128xf32>
    %1 = math.exp %0 : vector<8x128xf32>
    %c0_1 = arith.constant 0 : index
    %c0_2 = arith.constant 0 : index
    %2 = vector.load %arg2[%c0_1, %c0_2] : memref<8x128xf32, #tpu.memory_space<vmem>>, vector<8x128xf32>
    tpu.vector_store %arg2[%c0_1, %c0_2], %1 {strides = array<i32>} : memref<8x128xf32, #tpu.memory_space<vmem>>, vector<8x128xf32>,
    return
  }
  func.func @transform_0(%arg0: i32) -> (i32, i32) {
    %c0_i32 = arith.constant 0 : i32
    %c0_i32_0 = arith.constant 0 : i32
    return %arg0, %c0_i32 : i32, i32
  }
  func.func @transform_1(%arg0: i32) -> (i32, i32) {
    %c0_i32 = arith.constant 0 : i32
    %c0_i32_0 = arith.constant 0 : i32
    return %arg0, %c0_i32 : i32, i32
  }
}

</mosaic_0001>

<bundles_post_ra>
// kernel: tpu_custom_call.1
= control target key start
LH: loop header
LB: loop body
LE: loop exit
PB: predicated region body
PF: predicated region fallthrough
CT: control target
= control target key end

     0   :  { %6 = vsyncpa [#allocation3], 0  ;;  %s519_s0 = inlined_call_operand.hbm [shape: f32[16,128], index: 0, kind: input, shape index: {}]   ;;  %s520_s1 = inlined_call_operand.hbm [shape: f32[16,128], index: 1, kind: output, shape index: {}]  }
   0x1   :  { %8 = vsyncpa [#allocation3 + $0x1], 0 }
   0x2   :  { %9 = vsyncpa [#allocation4], 0 }
   0x3   :  { %11 = vsyncpa [#allocation4 + $0x1], 0  ;;  %s392_s6 = smov 0   ;;  %s394_s7 = smov 0  }
   0x4   :  { %s396_s8 = smov 0   ;;  %s398_s9 = smov 0  }
   0x5 LB: > { %s413_s10 = sadd.s32 4294967295, %s380_s9   ;;  %s224_s11 = sadd.s32 4294967294, %s380_s9   ;;  %s380_s9 = sphi %s398_s9, %s530_s9   ;;  %s376_s8 = sphi %s396_s8, %s529_s8   ;;  %s372_s7 = sphi %s394_s7, %s528_s7   ;;  %s368_s6 = sphi %s392_s6, %s527_s6  }
   0x6   : > { %s417_s12 = sadd.s32 1, %s380_s9   ;;  %s24_s13 = sadd.s32 1, %s376_s8 }
   0x7   : > { %s21_s14 = ssub.s32 %s380_s9, %s417_s12  ;;  %p31_p0 = scmp.ne.s32.totalorder %s376_s8, %s372_s7 }
   0x8   : > { %p22_p1 = scmp.eq.s32.totalorder %s21_s14, 0  ;;  %p32_p2 = scmp.eq.s32.totalorder %s380_s9, 0 }
   0x9   : > { %p37_p3 = scmp.ne.s32.totalorder %s372_s7, %s368_s6  ;;  %p38_p4 = scmp.eq.s32.totalorder %s413_s10, 0 }
   0xa   : > { %s429_s15 = scalar_select %p22_p1, %s376_s8, %s24_s13  }
   0xb   : > { %p431_p5 = por %p32_p2, %p31_p0  ;;  %p435_p6 = por %p38_p4, %p37_p3 }
   0xc   : > { %p61_p7 = scmp.eq.s32.totalorder %s413_s10, 1  ;;  %p67_p8 = scmp.eq.s32.totalorder %s224_s11, 1 }
   0xd   : > { %p248_p10 = scmp.lt.s32.totalorder %s380_s9, 2  ;;  %s87_s20 = sand.u32 1, %s376_s8  }
   0xe   : > { %p442_p11 = por %p61_p7, %p31_p0  ;;  %p446_p12 = por %p67_p8, %p37_p3 }
   0xf   : > { %s228_s21 = sshll.u32 %s380_s9, 3  ;;  %s227_s22 = sshll.u32 %s87_s20, 3 }
  0x10   : > { %s95_s25 = scalar_lea.hbm %s519_s0, %s228_s21  ;;  %s91_s27 = scalar_lea.vmem [#allocation2], %s227_s22 }
  0x11   : > { %s97_s26 = sshll.u32 %s95_s25, 4  ;;  %s99_s28 = sshll.u32 %s91_s27, 4  ;;  %s98_s26 = int_to_ptr.hbm [resolvable:$true] %s97_s26  ;;  %s100_s28 = int_to_ptr.vmem [resolvable:$true] %s99_s28 }
  0x12   : > { %p457_p13 = pnand %p248_p10, %p431_p5  ;;  %p229_p0 = scmp.ge.s32.totalorder %s380_s9, 1 }
  0x13   : > { %p104_p1 = scmp.lt.s32.totalorder %s380_s9, 3  ;;  %s88_s30 = scalar_lea.sflag [#allocation3], %s87_s20 }
  0x14   : > { %s284_s2 = sshra.s32 %s98_s26, 4  ;;  %p288_p3 = pneg %p457_p13  ;;  %s285_s2 = int_to_ptr.hbm [resolvable:$true] %s284_s2 }
  0x15   : > { %s286_s3 = scalar_lea.hbm %s285_s2, 8  ;;  %s291_s11 = scalar_lea.hbm %s519_s0, 16 }
  0x16   : > { %p287_p2 = scmp.ne.s32.totalorder %s285_s2, %s286_s3  ;;  %p292_p5 = scmp.lt.s32.totalorder %s285_s2, %s519_s0 }
  0x17   : > { %p293_p8 = scmp.lt.s32.totalorder %s291_s11, %s286_s3 }
  0x18   : > { %p289_p4 = pnand %p288_p3, %p287_p2 }
  0x19   : > { %p294_p10 = por %p293_p8, %p292_p5 }
  0x1a   : > { %p290_p7 = pneg %p289_p4 }
  0x1c   : > { %p295_p9 = pnand %p294_p10, %p290_p7 }
  0x1e   : > { %298 = shalt.err (!%p295_p9)
}
  0x1f   : > { %243 = dma.hbm_to_vmem [thread:$0]  (!%p457_p13), %s98_s26, 128, %s100_s28, %s88_s30  }
  0x20   : > { %p105_p2 = pnand %p229_p0, %p104_p1 }
  0x21   : > { %s478_s16 = sand.u32 (!%p105_p2), 1, %s372_s7  }
  0x22   : > { %108 = sbr.rel (%p105_p2) target bundleno = 55 (0x37), region = 24  ;;  %s230_s20 = sshll.u32 (!%p105_p2), %s478_s16, 3 }
  0x23   : > { %s111_s21 = scalar_lea.sflag (!%p105_p2), [#allocation3], %s478_s16  ;;  %s114_s22 = scalar_lea.vmem (!%p105_p2), [#allocation2], %s230_s20 }
  0x27   : > { %359 = dma.done.wait (%p435_p6), %s111_s21, 128  }
  0x28   : > { %361 = vsyncadd (%p435_p6), %s111_s21, 4294967168  ;;  %s233_s23 = sshll.u32 %s413_s10, 3  ;;  %v134_v0 = vld [vmem:[%s114_s22] sm:$0xff]  ;;  %s133_s27 = scalar_lea.vmem [#allocation5], %s230_s20 }
  0x29   : > { %v135_v1 = vmul.f32 1.442695, %v134_v0  ;;  %s149_s26 = scalar_lea.hbm %s520_s1, %s233_s23  ;;  %s151_s28 = sshll.u32 %s133_s27, 4  ;;  %s152_s28 = int_to_ptr.vmem [resolvable:$true] %s151_s28 }
  0x2a   : > { %s153_s29 = sshll.u32 %s149_s26, 4  ;;  %s139_s17 = scalar_lea.sflag [#allocation4], %s478_s16  ;;  %s154_s29 = int_to_ptr.hbm [resolvable:$true] %s153_s29 }
  0x2b   : > { %282 = vpow2.f32 %v135_v1  ;;  %s328_s30 = sshra.s32 %s154_s29, 4  ;;  %s334_s4 = scalar_lea.hbm %s520_s1, 16  ;;  %s329_s30 = int_to_ptr.hbm [resolvable:$true] %s328_s30 }
  0x2c   : > { %s330_s2 = scalar_lea.hbm %s329_s30, 8  ;;  %p335_p0 = scmp.lt.s32.totalorder %s329_s30, %s520_s1 }
  0x2d   : > { %p331_p6 = scmp.ne.s32.totalorder %s329_s30, %s330_s2  ;;  %p336_p1 = scmp.lt.s32.totalorder %s334_s4, %s330_s2 }
  0x2f   : > { %p332_p9 = pnand %p331_p6, %p442_p11  ;;  %p337_p3 = por %p336_p1, %p335_p0 }
  0x31   : > { %v283_v2 = vpop.eup %282  ;;  %p333_p13 = pneg %p332_p9 }
  0x32   : > { %137 = vst [vmem:[%s133_s27] sm:$0xff] %v283_v2 }
  0x33   : > { %p338_p4 = pnand %p337_p3, %p333_p13 }
  0x35   : > { %341 = shalt.err (!%p338_p4)
}
  0x36   : > { %238 = dma.vmem_to_hbm [thread:$0]  (%p442_p11), %s152_s28, 128, %s154_s29, %s139_s17  }
  0x37 PF: > { %s165_s13 = sand.u32 1, %s368_s6   ;;  %p526_p7 = scmp.ge.s32.totalorder %s380_s9, 2 }
  0x38   : > { %s166_s14 = scalar_lea.sflag [#allocation4], %s165_s13 }
  0x39   : > { %p245_p5 = pnand %p526_p7, %p446_p12 }
  0x3b   : > { %p246_p8 = pneg %p245_p5 }
  0x3d   : > { %363 = dma.done.wait (%p246_p8), %s166_s14, 128  }
  0x3e   : > { %365 = vsyncadd (%p246_p8), %s166_s14, 4294967168  ;;  %p14_p10 = scmp.ge.s32.totalorder %s417_s12, 4   ;;  %s527_s6 = smov %s372_s7 }
  0x3f   : > { %s528_s7 = smov %s376_s8  ;;  %s529_s8 = smov %s429_s15 }
  0x40   : > { %s530_s9 = smov %s417_s12  ;;  %16 = sbr.rel (!%p14_p10) target bundleno = 5 (0x5), region = 69 }
  0x45   :  { %172 = vsyncpa [#allocation3], 1 }
  0x46   :  { %174 = vsyncpa [#allocation3 + $0x1], 1 }
  0x47   :  { %175 = vsyncpa [#allocation4], 1 }
  0x48   :  { %177 = vsyncpa [#allocation4 + $0x1], 1 }

</bundles_post_ra>
